<compile_context>
chip_gen: v6e
topology: v6e:2x2x1
jax: 0.10.0
libtpu: 0.0.40
codegen_flags: <defaults>
</compile_context>

<pallas_src>
import functools

import jax
import jax.numpy as jnp
from jax.experimental import pallas as pl
from jax.experimental.pallas import tpu as pltpu

LANE = 128  # TPU lane width; hidden feature dims are padded to this.


def _mlp_kernel(x_ref, w1_ref, b1_ref, w2_ref, b2_ref, w3_ref, b3_ref, o_ref):
    # Three MXU matmuls with fused bias + ReLU on the VPU, f32 accumulation.
    out_dim = o_ref.shape[-1]
    x = x_ref[...]

    h1 = jnp.dot(x, w1_ref[...], preferred_element_type=jnp.float32) + b1_ref[...]
    h1 = jnp.maximum(h1, 0.0)

    h2 = jnp.dot(h1, w2_ref[...], preferred_element_type=jnp.float32) + b2_ref[...]
    h2 = jnp.maximum(h2, 0.0)

    h3 = jnp.dot(h2, w3_ref[...], preferred_element_type=jnp.float32) + b3_ref[...]

    # Store only the true output columns (narrow masked store; HBM bytes win
    # dominates the masked-vst cost when out_dim << 128).
    o_ref[...] = h3[:, :out_dim].astype(o_ref.dtype)


def _round_up(n, m):
    return pl.cdiv(n, m) * m


def _pad2(a, rows, cols):
    return jnp.pad(a, ((0, rows - a.shape[0]), (0, cols - a.shape[1])))


def pad_params(params, lane=LANE):
    """Zero-pad feature dims to the lane width (pure layout plumbing).

    Extra hidden lanes see zero weight + zero bias, so after ReLU they stay
    exactly 0 and contribute nothing downstream.  W3/b3 are also lane-padded
    (MXU-friendly); the kernel slices the result back to the true out_dim
    before storing.
    """
    w1, b1, w2, b2, w3, b3 = params
    h1 = _round_up(w1.shape[1], lane)   # 100 -> 128
    h2 = _round_up(w2.shape[1], lane)   # 100 -> 128
    op = _round_up(w3.shape[1], lane)   # 2*p -> 128
    return (
        _pad2(w1, w1.shape[0], h1), _pad2(b1, 1, h1),
        _pad2(w2, h1, h2),          _pad2(b2, 1, h2),
        _pad2(w3, h2, op),          _pad2(b3, 1, op),
    )


@functools.partial(jax.jit, static_argnames=("out_dim", "tm"))
def net_forward(x, padded_params, out_dim, tm=2048):
    """Forward pass of Net.

    x:              (batch, bit_len) float32
    padded_params:  output of pad_params(...)
    out_dim:        true output width (2*p); stored directly, no lane padding
    tm:             max batch rows per grid step (rounded/clamped to a
                    multiple of 128; clamped to the batch so small batches
                    use a single tile)
    """
    w1, b1, w2, b2, w3, b3 = padded_params
    batch, bit_len = x.shape

    # --- batch tiling ---------------------------------------------------
    # Clamp the tile to the (128-rounded) batch, then pad the batch to an
    # exact multiple of the tile.  Small batches => grid=(1,), minimal padding.
    batch_min_pad = _round_up(batch, LANE)
    tm = min(_round_up(max(tm, LANE), LANE), batch_min_pad)
    batch_pad = _round_up(batch, tm)
    if batch_pad != batch:
        x = jnp.pad(x, ((0, batch_pad - batch), (0, 0)))

    grid = (batch_pad // tm,)

    # Weights/biases: full-array blocks, constant index_map, single-buffered
    # -> DMA'd once and VMEM-resident across every batch tile.
    def pinned(a):
        return pl.BlockSpec(a.shape, lambda i: (0,) * a.ndim,
                            pipeline_mode=pl.Buffered(1))

    # Scheduler hint: real FLOPs (true feature widths) and real HBM bytes.
    flops = int(2 * batch_pad * (bit_len * 100 + 100 * 100 + 100 * out_dim))
    bytes_accessed = int(
        4 * (batch_pad * bit_len + batch_pad * out_dim
             + sum(p.size for p in padded_params))
    )

    out = pl.pallas_call(
        _mlp_kernel,
        out_shape=jax.ShapeDtypeStruct((batch_pad, out_dim), jnp.float32),
        grid=grid,
        in_specs=[
            pl.BlockSpec((tm, bit_len), lambda i: (i, 0)),  # streamed x tiles
            pinned(w1), pinned(b1),
            pinned(w2), pinned(b2),
            pinned(w3), pinned(b3),
        ],
        out_specs=pl.BlockSpec((tm, out_dim), lambda i: (i, 0)),
        compiler_params=pltpu.CompilerParams(
            dimension_semantics=("parallel",),
            vmem_limit_bytes=32 * 1024 * 1024),
        cost_estimate=pl.CostEstimate(
            flops=flops, transcendentals=0, bytes_accessed=bytes_accessed),
    )(x, w1, b1, w2, b2, w3, b3)

    # Slice away only the batch padding (output columns are already exact).
    return out[:batch]


def init_params(key, bit_len, p):
    """Deterministic init matching PyTorch nn.Linear default:
    U(-1/sqrt(fan_in), 1/sqrt(fan_in)) for both weight and bias."""
    def linear(key, fan_in, fan_out):
        kw, kb = jax.random.split(key)
        bound = 1.0 / jnp.sqrt(fan_in)
        # stored as (in, out) so the kernel does x @ W
        w = jax.random.uniform(kw, (fan_in, fan_out), jnp.float32, -bound, bound)
        b = jax.random.uniform(kb, (1, fan_out), jnp.float32, -bound, bound)
        return w, b

    k1, k2, k3 = jax.random.split(key, 3)
    w1, b1 = linear(k1, bit_len, 100)
    w2, b2 = linear(k2, 100, 100)
    w3, b3 = linear(k3, 100, 2 * p)
    return (w1, b1, w2, b2, w3, b3)


if __name__ == "__main__":
    # number_of_nodes = 6  =>  bit_len = 6*5/2 = 15 ;  layers p = 2  => out = 4
    number_of_nodes = 6
    bit_len = number_of_nodes * (number_of_nodes - 1) // 2
    p = 2
    out_dim = 2 * p
    batch = 300          # odd batch -> exercises clamping: one 384-row tile

    key = jax.random.PRNGKey(0)
    k_params, k_x = jax.random.split(key)

    params = init_params(k_params, bit_len, p)          # PyTorch-shaped params
    padded = pad_params(params)                          # MXU-friendly params
    x = jax.random.normal(k_x, (batch, bit_len), jnp.float32)

    out = net_forward(x, padded, out_dim)                # default tm, clamped
    out = jax.block_until_ready(out)

    # Pure-JAX reference check against the ORIGINAL (unpadded) parameters.
    w1, b1, w2, b2, w3, b3 = params
    ref = jnp.maximum(x @ w1 + b1, 0.0)
    ref = jnp.maximum(ref @ w2 + b2, 0.0)
    ref = ref @ w3 + b3

    assert out.shape == (batch, out_dim)
    assert jnp.allclose(out, ref, atol=1e-5, rtol=1e-5)

    print("KERNEL_OK")
</pallas_src>

<mosaic_0001>
module attributes {stable_mosaic.version = 11 : i64} {
  func.func @_mlp_kernel(%arg0: i32, %arg1: memref<384x15xf32, #tpu.memory_space<vmem>>, %arg2: memref<15x128xf32, #tpu.memory_space<vmem>>, %arg3: memref<1x128xf32, #tpu.memory_space<vmem>>, %arg4: memref<128x128xf32, #tpu.memory_space<vmem>>, %arg5: memref<1x128xf32, #tpu.memory_space<vmem>>, %arg6: memref<128x128xf32, #tpu.memory_space<vmem>>, %arg7: memref<1x128xf32, #tpu.memory_space<vmem>>, %arg8: memref<384x4xf32, #tpu.memory_space<vmem>>) attributes {dimension_semantics = [#tpu.dimension_semantics<parallel>], iteration_bounds = array<i64: 1>, scalar_prefetch = 0 : i64, scratch_operands = 0 : i64, tpu.core_type = #tpu.core_type<tc>, window_params = [{transform_indices = @transform_0, window_bounds = array<i64: 384, 15>}, {pipeline_mode = #tpu.pipeline_mode<synchronous>, transform_indices = @transform_1, window_bounds = array<i64: 15, 128>}, {pipeline_mode = #tpu.pipeline_mode<synchronous>, transform_indices = @transform_2, window_bounds = array<i64: 1, 128>}, {pipeline_mode = #tpu.pipeline_mode<synchronous>, transform_indices = @transform_3, window_bounds = array<i64: 128, 128>}, {pipeline_mode = #tpu.pipeline_mode<synchronous>, transform_indices = @transform_4, window_bounds = array<i64: 1, 128>}, {pipeline_mode = #tpu.pipeline_mode<synchronous>, transform_indices = @transform_5, window_bounds = array<i64: 128, 128>}, {pipeline_mode = #tpu.pipeline_mode<synchronous>, transform_indices = @transform_6, window_bounds = array<i64: 1, 128>}, {transform_indices = @transform_7, window_bounds = array<i64: 384, 4>}]} {
    %c0 = arith.constant 0 : index
    %c0_0 = arith.constant 0 : index
    %0 = vector.load %arg1[%c0, %c0_0] : memref<384x15xf32, #tpu.memory_space<vmem>>, vector<384x15xf32>
    %c0_1 = arith.constant 0 : index
    %c0_2 = arith.constant 0 : index
    %1 = vector.load %arg2[%c0_1, %c0_2] : memref<15x128xf32, #tpu.memory_space<vmem>>, vector<15x128xf32>
    %cst = arith.constant dense<0.000000e+00> : vector<384x128xf32>
    %2 = tpu.matmul %0, %1, %cst {dimension_numbers = #tpu.dot_dimension_numbers<[1], [0], [0], [1], [0, 0, 1, 1], [], []>} : vector<384x15xf32>, vector<15x128xf32>, vector<384x128xf32> -> vector<384x128xf32>
    %c0_3 = arith.constant 0 : index
    %c0_4 = arith.constant 0 : index
    %3 = vector.load %arg3[%c0_3, %c0_4] : memref<1x128xf32, #tpu.memory_space<vmem>>, vector<1x128xf32>
    %4 = vector.broadcast %3 : vector<1x128xf32> to vector<384x128xf32>
    %5 = arith.addf %2, %4 : vector<384x128xf32>
    %cst_5 = arith.constant 0.000000e+00 : f32
    %6 = vector.broadcast %cst_5 : f32 to vector<384x128xf32>
    %7 = arith.maximumf %5, %6 : vector<384x128xf32>
    %c0_6 = arith.constant 0 : index
    %c0_7 = arith.constant 0 : index
    %8 = vector.load %arg4[%c0_6, %c0_7] : memref<128x128xf32, #tpu.memory_space<vmem>>, vector<128x128xf32>
    %cst_8 = arith.constant dense<0.000000e+00> : vector<384x128xf32>
    %9 = tpu.matmul %7, %8, %cst_8 {dimension_numbers = #tpu.dot_dimension_numbers<[1], [0], [0], [1], [0, 0, 1, 1], [], []>} : vector<384x128xf32>, vector<128x128xf32>, vector<384x128xf32> -> vector<384x128xf32>
    %c0_9 = arith.constant 0 : index
    %c0_10 = arith.constant 0 : index
    %10 = vector.load %arg5[%c0_9, %c0_10] : memref<1x128xf32, #tpu.memory_space<vmem>>, vector<1x128xf32>
    %11 = vector.broadcast %10 : vector<1x128xf32> to vector<384x128xf32>
    %12 = arith.addf %9, %11 : vector<384x128xf32>
    %cst_11 = arith.constant 0.000000e+00 : f32
    %13 = vector.broadcast %cst_11 : f32 to vector<384x128xf32>
    %14 = arith.maximumf %12, %13 : vector<384x128xf32>
    %c0_12 = arith.constant 0 : index
    %c0_13 = arith.constant 0 : index
    %15 = vector.load %arg6[%c0_12, %c0_13] : memref<128x128xf32, #tpu.memory_space<vmem>>, vector<128x128xf32>
    %cst_14 = arith.constant dense<0.000000e+00> : vector<384x128xf32>
    %16 = tpu.matmul %14, %15, %cst_14 {dimension_numbers = #tpu.dot_dimension_numbers<[1], [0], [0], [1], [0, 0, 1, 1], [], []>} : vector<384x128xf32>, vector<128x128xf32>, vector<384x128xf32> -> vector<384x128xf32>
    %c0_15 = arith.constant 0 : index
    %c0_16 = arith.constant 0 : index
    %17 = vector.load %arg7[%c0_15, %c0_16] : memref<1x128xf32, #tpu.memory_space<vmem>>, vector<1x128xf32>
    %18 = vector.broadcast %17 : vector<1x128xf32> to vector<384x128xf32>
    %19 = arith.addf %16, %18 : vector<384x128xf32>
    %20 = vector.extract_strided_slice %19 {offsets = [0, 0], sizes = [384, 4], strides = [1, 1]} : vector<384x128xf32> to vector<384x4xf32>
    %c0_17 = arith.constant 0 : index
    %c0_18 = arith.constant 0 : index
    %21 = vector.load %arg8[%c0_17, %c0_18] : memref<384x4xf32, #tpu.memory_space<vmem>>, vector<384x4xf32>
    tpu.vector_store %arg8[%c0_17, %c0_18], %20 {strides = array<i32>} : memref<384x4xf32, #tpu.memory_space<vmem>>, vector<384x4xf32>,
    return
  }
  func.func @transform_0(%arg0: i32) -> (i32, i32) {
    %c0_i32 = arith.constant 0 : i32
    %c0_i32_0 = arith.constant 0 : i32
    return %arg0, %c0_i32 : i32, i32
  }
  func.func @transform_1(%arg0: i32) -> (i32, i32) {
    %c0_i32 = arith.constant 0 : i32
    %c0_i32_0 = arith.constant 0 : i32
    %c0_i32_1 = arith.constant 0 : i32
    return %c0_i32, %c0_i32_0 : i32, i32
  }
  func.func @transform_2(%arg0: i32) -> (i32, i32) {
    %c0_i32 = arith.constant 0 : i32
    %c0_i32_0 = arith.constant 0 : i32
    %c0_i32_1 = arith.constant 0 : i32
    return %c0_i32, %c0_i32_0 : i32, i32
  }
  func.func @transform_3(%arg0: i32) -> (i32, i32) {
    %c0_i32 = arith.constant 0 : i32
    %c0_i32_0 = arith.constant 0 : i32
    %c0_i32_1 = arith.constant 0 : i32
    return %c0_i32, %c0_i32_0 : i32, i32
  }
  func.func @transform_4(%arg0: i32) -> (i32, i32) {
    %c0_i32 = arith.constant 0 : i32
    %c0_i32_0 = arith.constant 0 : i32
    %c0_i32_1 = arith.constant 0 : i32
    return %c0_i32, %c0_i32_0 : i32, i32
  }
  func.func @transform_5(%arg0: i32) -> (i32, i32) {
    %c0_i32 = arith.constant 0 : i32
    %c0_i32_0 = arith.constant 0 : i32
    %c0_i32_1 = arith.constant 0 : i32
    return %c0_i32, %c0_i32_0 : i32, i32
  }
  func.func @transform_6(%arg0: i32) -> (i32, i32) {
    %c0_i32 = arith.constant 0 : i32
    %c0_i32_0 = arith.constant 0 : i32
    %c0_i32_1 = arith.constant 0 : i32
    return %c0_i32, %c0_i32_0 : i32, i32
  }
  func.func @transform_7(%arg0: i32) -> (i32, i32) {
    %c0_i32 = arith.constant 0 : i32
    %c0_i32_0 = arith.constant 0 : i32
    return %arg0, %c0_i32 : i32, i32
  }
}

</mosaic_0001>

<bundles_post_ra>
// kernel: net_forward.1
= control target key start
LH: loop header
LB: loop body
LE: loop exit
PB: predicated region body
PF: predicated region fallthrough
CT: control target
= control target key end

     0   :  { %vm228_vm0 = vcmask 1046528   ;;  %vm83_vm1 = vcmask 121856   ;;  %vm1289_vm2 = vcmask 31744   ;;  %s2578_s1 = inlined_call_operand.vmem [shape: f32[15,128], index: 1, kind: input, shape index: {}]   ;;  %s2579_s0 = inlined_call_operand.vmem [shape: f32[384,15], index: 0, kind: input, shape index: {}]   ;;  %s2580_s3 = inlined_call_operand.vmem [shape: f32[128,128], index: 3, kind: input, shape index: {}]   ;;  %s2581_s5 = inlined_call_operand.vmem [shape: f32[128,128], index: 5, kind: input, shape index: {}]   ;;  %s2582_s2 = inlined_call_operand.vmem [shape: f32[1,128], index: 2, kind: input, shape index: {}]   ;;  %s2583_s4 = inlined_call_operand.vmem [shape: f32[1,128], index: 4, kind: input, shape index: {}]   ;;  %s2584_s6 = inlined_call_operand.vmem [shape: f32[1,128], index: 6, kind: input, shape index: {}]   ;;  %s2585_s7 = inlined_call_operand.vmem [shape: f32[384,4], index: 7, kind: output, shape index: {}]  }
   0x1   :  { %v75_v0 = vld [vmem:[%s2578_s1 + $0x8] sm:$0x7f]  ;;  %v74_v1 = vld [vmem:[%s2578_s1] sm:$0xff]  ;;  %v28_v4 = vld [vmem:[%s2579_s0 + $0x10] sm:$0xff] }
   0x2   :  { %v26_v2 = vld [vmem:[%s2579_s0] sm:$0xff]  ;;  %1572 = vmatprep.subr.msk.mxu0 %vm228_vm0, %v75_v0  ;;  %v27_v3 = vld [vmem:[%s2579_s0 + $0x8] sm:$0xff]  ;;  %1856 = vmatprep.subr.msk.mxu1 %vm228_vm0, %v75_v0  ;;  %v29_v5 = vld [vmem:[%s2579_s0 + $0x18] sm:$0xff] }
   0x3   :  { %1576 = vmatprep.mubr.msk.f32.mxu0 %vm83_vm1, %v26_v2  ;;  %1573 = vmatpush3.msk.msra.mxu0 %vm228_vm0, %v75_v0  ;;  %v30_v6 = vld [vmem:[%s2579_s0 + $0x20] sm:$0xff]  ;;  %v51_v8 = vld [vmem:[%s2579_s0 + $0xc8] sm:$0xff]  ;;  %v52_v9 = vld [vmem:[%s2579_s0 + $0xd0] sm:$0xff] }
   0x4   :  { %1574 = vmatprep.subr.mxu0 %v74_v1  ;;  %1858 = vmatpush3.msk.msra.mxu1 %vm228_vm0, %v75_v0  ;;  %v50_v7 = vld [vmem:[%s2579_s0 + $0xc0] sm:$0xff]  ;;  %v31_v10 = vld [vmem:[%s2579_s0 + $0x28] sm:$0xff]  ;;  %v32_v11 = vld [vmem:[%s2579_s0 + $0x30] sm:$0xff] }
   0x5   :  { %1575 = vmatpush3.msra.mxu0 %v74_v1  ;;  %1857 = vmatprep.subr.mxu1 %v74_v1  ;;  %v53_v12 = vld [vmem:[%s2579_s0 + $0xd8] sm:$0xff]  ;;  %v54_v13 = vld [vmem:[%s2579_s0 + $0xe0] sm:$0xff]  ;;  %v55_v16 = vld [vmem:[%s2579_s0 + $0xe8] sm:$0xff] }
   0x6   :  { %1577 = vmatmul.mubr.msk.f32.vlgmr.msra.gmra.mxu0 %vm83_vm1, %v27_v3  ;;  %1859 = vmatpush3.msra.mxu1 %v74_v1  ;;  %v33_v14 = vld [vmem:[%s2579_s0 + $0x38] sm:$0xff]  ;;  %v34_v15 = vld [vmem:[%s2579_s0 + $0x40] sm:$0xff]  ;;  %v56_v17 = vld [vmem:[%s2579_s0 + $0xf0] sm:$0xff] }
   0x7   :  { %1579 = vmatprep.mubr.msk.f32.mxu0 %vm83_vm1, %v28_v4  ;;  %1612 = vmatprep.mubr.msk.f32.mxu1 %vm83_vm1, %v50_v7  ;;  %v600_v18 = vld [vmem:[%s2580_s3 + $0x78] sm:$0xff]  ;;  %v599_v19 = vld [vmem:[%s2580_s3 + $0x70] sm:$0xff]  ;;  %v35_v20 = vld [vmem:[%s2579_s0 + $0x48] sm:$0xff] }
   0x8   :  { %1613 = vmatmul.mubr.msk.f32.vlgmr.msra.gmra.mxu1 %vm83_vm1, %v51_v8  ;;  %1648 = vmatprep.subr.mxu1 %v600_v18  ;;  %v36_v21 = vld [vmem:[%s2579_s0 + $0x50] sm:$0xff]  ;;  %v57_v22 = vld [vmem:[%s2579_s0 + $0xf8] sm:$0xff]  ;;  %v58_v23 = vld [vmem:[%s2579_s0 + $0x100] sm:$0xff] }
   0x9   :  { %1615 = vmatprep.mubr.msk.f32.mxu1 %vm83_vm1, %v52_v9  ;;  %1649 = vmatpush3.msra.mxu1 %v600_v18  ;;  %v598_v24 = vld [vmem:[%s2580_s3 + $0x68] sm:$0xff]  ;;  %v37_v25 = vld [vmem:[%s2579_s0 + $0x58] sm:$0xff]  ;;  %v597_v26 = vld [vmem:[%s2580_s3 + $0x60] sm:$0xff] }
   0xa   :  { %1580 = vmatmul.mubr.msk.f32.gmra.mxu0 %vm83_vm1, %v29_v5  ;;  %1650 = vmatprep.subr.mxu1 %v599_v19  ;;  %v38_v27 = vld [vmem:[%s2579_s0 + $0x60] sm:$0xff]  ;;  %v59_v28 = vld [vmem:[%s2579_s0 + $0x108] sm:$0xff]  ;;  %v60_v29 = vld [vmem:[%s2579_s0 + $0x110] sm:$0xff] }
   0xb   :  { %1582 = vmatprep.mubr.msk.f32.mxu0 %vm83_vm1, %v30_v6  ;;  %1651 = vmatpush3.msra.mxu1 %v599_v19  ;;  %v596_v30 = vld [vmem:[%s2580_s3 + $0x58] sm:$0xff]  ;;  %v39_v31 = vld [vmem:[%s2579_s0 + $0x68] sm:$0xff]  ;;  %v40_v32 = vld [vmem:[%s2579_s0 + $0x70] sm:$0xff] }
   0xc   :  { %1616 = vmatmul.mubr.msk.f32.gmra.mxu1 %vm83_vm1, %v53_v12  ;;  %1652 = vmatprep.subr.mxu1 %v598_v24  ;;  %v61_v33 = vld [vmem:[%s2579_s0 + $0x118] sm:$0xff]  ;;  %v62_v34 = vld [vmem:[%s2579_s0 + $0x120] sm:$0xff]  ;;  %v595_v35 = vld [vmem:[%s2580_s3 + $0x50] sm:$0xff] }
   0xd   :  { %1618 = vmatprep.mubr.msk.f32.mxu1 %vm83_vm1, %v54_v13  ;;  %1653 = vmatpush3.msra.mxu1 %v598_v24  ;;  %v41_v36 = vld [vmem:[%s2579_s0 + $0x78] sm:$0xff]  ;;  %v594_v37 = vld [vmem:[%s2580_s3 + $0x48] sm:$0xff]  ;;  %v42_v38 = vld [vmem:[%s2579_s0 + $0x80] sm:$0xff] }
   0xe   :  { %1583 = vmatmul.mubr.msk.f32.gmra.mxu0 %vm83_vm1, %v31_v10  ;;  %1654 = vmatprep.subr.mxu1 %v597_v26  ;;  %v63_v39 = vld [vmem:[%s2579_s0 + $0x128] sm:$0xff]  ;;  %v64_v40 = vld [vmem:[%s2579_s0 + $0x130] sm:$0xff]  ;;  %v593_v41 = vld [vmem:[%s2580_s3 + $0x40] sm:$0xff] }
   0xf   :  { %1585 = vmatprep.mubr.msk.f32.mxu0 %vm83_vm1, %v32_v11  ;;  %1655 = vmatpush3.msra.mxu1 %v597_v26  ;;  %v43_v42 = vld [vmem:[%s2579_s0 + $0x88] sm:$0xff]  ;;  %v44_v43 = vld [vmem:[%s2579_s0 + $0x90] sm:$0xff]  ;;  %v65_v44 = vld [vmem:[%s2579_s0 + $0x138] sm:$0xff] }
  0x10   :  { %1619 = vmatmul.mubr.msk.f32.gmra.mxu1 %vm83_vm1, %v55_v16  ;;  %1656 = vmatprep.subr.mxu1 %v596_v30  ;;  %v66_v45 = vld [vmem:[%s2579_s0 + $0x140] sm:$0xff]  ;;  %v592_v46 = vld [vmem:[%s2580_s3 + $0x38] sm:$0xff]  ;;  %v591_v48 = vld [vmem:[%s2580_s3 + $0x30] sm:$0xff] }
  0x11   :  { %1621 = vmatprep.mubr.msk.f32.mxu1 %vm83_vm1, %v56_v17  ;;  %1657 = vmatpush3.msra.mxu1 %v596_v30  ;;  %v45_v47 = vld [vmem:[%s2579_s0 + $0x98] sm:$0xff]  ;;  %v46_v49 = vld [vmem:[%s2579_s0 + $0xa0] sm:$0xff]  ;;  %v67_v50 = vld [vmem:[%s2579_s0 + $0x148] sm:$0xff] }
  0x12   :  { %1586 = vmatmul.mubr.msk.f32.gmra.mxu0 %vm83_vm1, %v33_v14  ;;  %1658 = vmatprep.subr.mxu1 %v595_v35  ;;  %v68_v51 = vld [vmem:[%s2579_s0 + $0x150] sm:$0xff]  ;;  %v590_v52 = vld [vmem:[%s2580_s3 + $0x28] sm:$0xff]  ;;  %v69_v55 = vld [vmem:[%s2579_s0 + $0x158] sm:$0xff] }
  0x13   :  { %1588 = vmatprep.mubr.msk.f32.mxu0 %vm83_vm1, %v34_v15  ;;  %1659 = vmatpush3.msra.mxu1 %v595_v35  ;;  %v47_v53 = vld [vmem:[%s2579_s0 + $0xa8] sm:$0xff]  ;;  %v48_v54 = vld [vmem:[%s2579_s0 + $0xb0] sm:$0xff]  ;;  %v70_v56 = vld [vmem:[%s2579_s0 + $0x160] sm:$0xff] }
  0x14   :  { %1622 = vmatmul.mubr.msk.f32.gmra.mxu1 %vm83_vm1, %v57_v22  ;;  %1660 = vmatprep.subr.mxu1 %v594_v37  ;;  %v589_v57 = vld [vmem:[%s2580_s3 + $0x20] sm:$0xff]  ;;  %v49_v58 = vld [vmem:[%s2579_s0 + $0xb8] sm:$0xff]  ;;  %v71_v60 = vld [vmem:[%s2579_s0 + $0x168] sm:$0xff] }
  0x15   :  { %1624 = vmatprep.mubr.msk.f32.mxu1 %vm83_vm1, %v58_v23  ;;  %1661 = vmatpush3.msra.mxu1 %v594_v37  ;;  %v588_v59 = vld [vmem:[%s2580_s3 + $0x18] sm:$0xff]  ;;  %v72_v61 = vld [vmem:[%s2579_s0 + $0x170] sm:$0xff]  ;;  %v586_v0 = vld [vmem:[%s2580_s3 + $0x8] sm:$0xff] }
  0x16   :  { %1589 = vmatmul.mubr.msk.f32.gmra.mxu0 %vm83_vm1, %v35_v20  ;;  %1662 = vmatprep.subr.mxu1 %v593_v41  ;;  %v587_v62 = vld [vmem:[%s2580_s3 + $0x10] sm:$0xff]  ;;  %v73_v63 = vld [vmem:[%s2579_s0 + $0x178] sm:$0xff]  ;;  %v585_v1 = vld [vmem:[%s2580_s3] sm:$0xff] }
  0x17   :  { %1591 = vmatprep.mubr.msk.f32.mxu0 %vm83_vm1, %v36_v21  ;;  %1663 = vmatpush3.msra.mxu1 %v593_v41  ;;  %v976_v2 = vld [vmem:[%s2581_s5 + $0x78] sm:$0xff]  ;;  %v975_v3 = vld [vmem:[%s2581_s5 + $0x70] sm:$0xff]  ;;  %v974_v4 = vld [vmem:[%s2581_s5 + $0x68] sm:$0xff] }
  0x18   :  { %1625 = vmatmul.mubr.msk.f32.gmra.mxu1 %vm83_vm1, %v59_v28  ;;  %1664 = vmatprep.subr.mxu1 %v592_v46  ;;  %v973_v5 = vld [vmem:[%s2581_s5 + $0x60] sm:$0xff]  ;;  %v972_v6 = vld [vmem:[%s2581_s5 + $0x58] sm:$0xff]  ;;  %v971_v7 = vld [vmem:[%s2581_s5 + $0x50] sm:$0xff] }
  0x19   :  { %1627 = vmatprep.mubr.msk.f32.mxu1 %vm83_vm1, %v60_v29  ;;  %1665 = vmatpush3.msra.mxu1 %v592_v46  ;;  %v970_v8 = vld [vmem:[%s2581_s5 + $0x48] sm:$0xff]  ;;  %v969_v9 = vld [vmem:[%s2581_s5 + $0x40] sm:$0xff]  ;;  %v968_v10 = vld [vmem:[%s2581_s5 + $0x38] sm:$0xff] }
  0x1a   :  { %1592 = vmatmul.mubr.msk.f32.gmra.mxu0 %vm83_vm1, %v37_v25  ;;  %1666 = vmatprep.subr.mxu1 %v591_v48  ;;  %v967_v11 = vld [vmem:[%s2581_s5 + $0x30] sm:$0xff]  ;;  %v966_v12 = vld [vmem:[%s2581_s5 + $0x28] sm:$0xff]  ;;  %v965_v13 = vld [vmem:[%s2581_s5 + $0x20] sm:$0xff] }
  0x1b   :  { %1594 = vmatprep.mubr.msk.f32.mxu0 %vm83_vm1, %v38_v27  ;;  %1667 = vmatpush3.msra.mxu1 %v591_v48  ;;  %v964_v14 = vld [vmem:[%s2581_s5 + $0x18] sm:$0xff]  ;;  %v963_v15 = vld [vmem:[%s2581_s5 + $0x10] sm:$0xff]  ;;  %v2191_v16 = vld [vmem:[%s2582_s2] ss:$0 sm:$0xff] }
  0x1c   :  { %1628 = vmatmul.mubr.msk.f32.gmra.mxu1 %vm83_vm1, %v61_v33  ;;  %1668 = vmatprep.subr.mxu1 %v590_v52 }
  0x1d   :  { %1630 = vmatprep.mubr.msk.f32.mxu1 %vm83_vm1, %v62_v34  ;;  %1669 = vmatpush3.msra.mxu1 %v590_v52 }
  0x1e   :  { %1595 = vmatmul.mubr.msk.f32.gmra.mxu0 %vm83_vm1, %v39_v31  ;;  %1670 = vmatprep.subr.mxu1 %v589_v57 }
  0x1f   :  { %1597 = vmatprep.mubr.msk.f32.mxu0 %vm83_vm1, %v40_v32  ;;  %1671 = vmatpush3.msra.mxu1 %v589_v57 }
  0x20   :  { %1631 = vmatmul.mubr.msk.f32.gmra.mxu1 %vm83_vm1, %v63_v39  ;;  %1672 = vmatprep.subr.mxu1 %v588_v59 }
  0x21   :  { %1633 = vmatprep.mubr.msk.f32.mxu1 %vm83_vm1, %v64_v40  ;;  %1673 = vmatpush3.msra.mxu1 %v588_v59 }
  0x22   :  { %1598 = vmatmul.mubr.msk.f32.gmra.mxu0 %vm83_vm1, %v41_v36  ;;  %1674 = vmatprep.subr.mxu1 %v587_v62 }
  0x23   :  { %1600 = vmatprep.mubr.msk.f32.mxu0 %vm83_vm1, %v42_v38  ;;  %1675 = vmatpush3.msra.mxu1 %v587_v62 }
  0x24   :  { %1634 = vmatmul.mubr.msk.f32.gmra.mxu1 %vm83_vm1, %v65_v44  ;;  %1676 = vmatprep.subr.mxu1 %v586_v0 }
  0x25   :  { %1636 = vmatprep.mubr.msk.f32.mxu1 %vm83_vm1, %v66_v45  ;;  %1677 = vmatpush3.msra.mxu1 %v586_v0 }
  0x26   :  { %1601 = vmatmul.mubr.msk.f32.gmra.mxu0 %vm83_vm1, %v43_v42  ;;  %1678 = vmatprep.subr.mxu1 %v585_v1 }
  0x27   :  { %1603 = vmatprep.mubr.msk.f32.mxu0 %vm83_vm1, %v44_v43  ;;  %1679 = vmatpush3.msra.mxu1 %v585_v1 }
  0x28   :  { %1637 = vmatmul.mubr.msk.f32.gmra.mxu1 %vm83_vm1, %v67_v50  ;;  %1752 = vmatprep.subr.mxu0 %v976_v2 }
  0x29   :  { %1639 = vmatprep.mubr.msk.f32.mxu1 %vm83_vm1, %v68_v51  ;;  %1753 = vmatpush3.msra.mxu0 %v976_v2 }
  0x2a   :  { %1604 = vmatmul.mubr.msk.f32.gmra.mxu0 %vm83_vm1, %v45_v47  ;;  %1754 = vmatprep.subr.mxu0 %v975_v3 }
  0x2b   :  { %1606 = vmatprep.mubr.msk.f32.mxu0 %vm83_vm1, %v46_v49  ;;  %1755 = vmatpush3.msra.mxu0 %v975_v3 }
  0x2c   :  { %1640 = vmatmul.mubr.msk.f32.gmra.mxu1 %vm83_vm1, %v69_v55  ;;  %1756 = vmatprep.subr.mxu0 %v974_v4 }
  0x2d   :  { %1642 = vmatprep.mubr.msk.f32.mxu1 %vm83_vm1, %v70_v56  ;;  %1757 = vmatpush3.msra.mxu0 %v974_v4 }
  0x2e   :  { %1607 = vmatmul.mubr.msk.f32.gmra.mxu0 %vm83_vm1, %v47_v53  ;;  %1758 = vmatprep.subr.mxu0 %v973_v5 }
  0x2f   :  { %1609 = vmatprep.mubr.msk.f32.mxu0 %vm83_vm1, %v48_v54  ;;  %1759 = vmatpush3.msra.mxu0 %v973_v5 }
  0x30   :  { %1643 = vmatmul.mubr.msk.f32.gmra.mxu1 %vm83_vm1, %v71_v60  ;;  %1760 = vmatprep.subr.mxu0 %v972_v6 }
  0x31   :  { %1645 = vmatprep.mubr.msk.f32.mxu1 %vm83_vm1, %v72_v61  ;;  %1761 = vmatpush3.msra.mxu0 %v972_v6 }
  0x32   :  { %1610 = vmatmul.mubr.msk.f32.gmra.mxu0 %vm83_vm1, %v49_v58  ;;  %1762 = vmatprep.subr.mxu0 %v971_v7 }
  0x33   :  { %1763 = vmatpush3.msra.mxu0 %v971_v7 }
  0x34   :  { %1646 = vmatmul.mubr.msk.f32.gmra.mxu1 %vm83_vm1, %v73_v63  ;;  %1764 = vmatprep.subr.mxu0 %v970_v8 }
  0x35   :  { %1765 = vmatpush3.msra.mxu0 %v970_v8 }
  0x36   :  { %1766 = vmatprep.subr.mxu0 %v969_v9 }
  0x37   :  { %1767 = vmatpush3.msra.mxu0 %v969_v9 }
  0x38   :  { %1768 = vmatprep.subr.mxu0 %v968_v10 }
  0x39   :  { %1769 = vmatpush3.msra.mxu0 %v968_v10 }
  0x3a   :  { %1770 = vmatprep.subr.mxu0 %v967_v11 }
  0x3b   :  { %1771 = vmatpush3.msra.mxu0 %v967_v11 }
  0x3c   :  { %1772 = vmatprep.subr.mxu0 %v966_v12 }
  0x3d   :  { %1773 = vmatpush3.msra.mxu0 %v966_v12 }
  0x3e   :  { %1774 = vmatprep.subr.mxu0 %v965_v13 }
  0x3f   :  { %1775 = vmatpush3.msra.mxu0 %v965_v13 }
  0x40   :  { %1776 = vmatprep.subr.mxu0 %v964_v14 }
  0x41   :  { %1777 = vmatpush3.msra.mxu0 %v964_v14 }
  0x42   :  { %1778 = vmatprep.subr.mxu0 %v963_v15 }
  0x43   :  { %1779 = vmatpush3.msra.mxu0 %v963_v15 }
  0xc6   :  { %v1578_v17 = vpop.f32.mrf.mxu0 }
  0xc7   :  { %v304_v18 = vadd.f32 %v1578_v17, %v2191_v16 }
  0xc8   :  { %v298_v19 = vpop.f32.mrf.mxu0  ;;  %v2195_v23 = vpop.f32.mrf.mxu1 }
  0xc9   :  { %v299_v20 = vadd.f32 %v2191_v16, %v298_v19  ;;  %v538_v24 = vmax.f32 %v304_v18, 0.0 }
  0xca   :  { %v1581_v21 = vpop.f32.mrf.mxu0  ;;  %v2199_v28 = vpop.f32.mrf.mxu1 }
  0xcb   :  { %v537_v22 = vmax.f32 %v299_v20, 0.0  ;;  %v314_v25 = vadd.f32 %v1581_v21, %v2191_v16 }
  0xcc   :  { %v308_v26 = vpop.f32.mrf.mxu0  ;;  %v2201_v31 = vpop.f32.mrf.mxu1 }
  0xcd   :  { %v309_v27 = vadd.f32 %v2191_v16, %v308_v26  ;;  %1680 = vmatprep.mubr.f32.mxu1 %v537_v22  ;;  %v540_v32 = vmax.f32 %v314_v25, 0.0 }
  0xce   :  { %v1584_v29 = vpop.f32.mrf.mxu0  ;;  %1681 = vmatmul.mubr.f32.vlgmr.msra.gmra.mxu1 %v538_v24  ;;  %v2205_v36 = vpop.f32.mrf.mxu1 }
  0xcf   :  { %v539_v30 = vmax.f32 %v309_v27, 0.0  ;;  %v324_v33 = vadd.f32 %v1584_v29, %v2191_v16 }
  0xd0   :  { %v318_v34 = vpop.f32.mrf.mxu0  ;;  %v2207_v39 = vpop.f32.mrf.mxu1 }
  0xd1   :  { %v319_v35 = vadd.f32 %v2191_v16, %v318_v34  ;;  %1683 = vmatprep.mubr.f32.mxu1 %v539_v30  ;;  %v542_v40 = vmax.f32 %v324_v33, 0.0 }
  0xd2   :  { %v1587_v37 = vpop.f32.mrf.mxu0  ;;  %1684 = vmatmul.mubr.f32.gmra.mxu1 %v540_v32  ;;  %v2211_v44 = vpop.f32.mrf.mxu1 }
  0xd3   :  { %v541_v38 = vmax.f32 %v319_v35, 0.0  ;;  %v334_v41 = vadd.f32 %v1587_v37, %v2191_v16  ;;  %v419_v37 = vadd.f32 %v2191_v16, %v2199_v28 }
  0xd4   :  { %v328_v42 = vpop.f32.mrf.mxu0  ;;  %v2214_v50 = vpop.f32.mrf.mxu1 }
  0xd5   :  { %v329_v43 = vadd.f32 %v2191_v16, %v328_v42  ;;  %1686 = vmatprep.mubr.f32.mxu1 %v541_v38  ;;  %v544_v47 = vmax.f32 %v334_v41, 0.0 }
  0xd6   :  { %v1590_v45 = vpop.f32.mrf.mxu0  ;;  %1687 = vmatmul.mubr.f32.gmra.mxu1 %v542_v40  ;;  %v2218_v57 = vpop.f32.mrf.mxu1 }
  0xd7   :  { %v543_v46 = vmax.f32 %v329_v43, 0.0  ;;  %v344_v48 = vadd.f32 %v1590_v45, %v2191_v16 }
  0xd8   :  { %v338_v49 = vpop.f32.mrf.mxu0  ;;  %v2222_v0 = vpop.f32.mrf.mxu1 }
  0xd9   :  { %v339_v51 = vadd.f32 %v2191_v16, %v338_v49  ;;  %1689 = vmatprep.mubr.f32.mxu1 %v543_v46  ;;  %v546_v54 = vmax.f32 %v344_v48, 0.0  ;;  %v561_v46 = vmax.f32 %v419_v37, 0.0  ;;  %v424_v49 = vadd.f32 %v2195_v23, %v2191_v16 }
  0xda   :  { %v1593_v52 = vpop.f32.mrf.mxu0  ;;  %1690 = vmatmul.mubr.f32.gmra.mxu1 %v544_v47  ;;  %v2226_v7 = vpop.f32.mrf.mxu1  ;;  %v429_v47 = vadd.f32 %v2191_v16, %v2205_v36  ;;  %v449_v36 = vadd.f32 %v2191_v16, %v2218_v57 }
  0xdb   :  { %v545_v53 = vmax.f32 %v339_v51, 0.0  ;;  %v354_v55 = vadd.f32 %v1593_v52, %v2191_v16  ;;  %v439_v52 = vadd.f32 %v2191_v16, %v2211_v44  ;;  %v459_v44 = vadd.f32 %v2191_v16, %v2226_v7 }
  0xdc   :  { %v348_v56 = vpop.f32.mrf.mxu0  ;;  %v2230_v14 = vpop.f32.mrf.mxu1  ;;  %v563_v28 = vmax.f32 %v429_v47, 0.0 }
  0xdd   :  { %v349_v58 = vadd.f32 %v2191_v16, %v348_v56  ;;  %1692 = vmatprep.mubr.f32.mxu1 %v545_v53  ;;  %v548_v61 = vmax.f32 %v354_v55, 0.0  ;;  %v562_v53 = vmax.f32 %v424_v49, 0.0  ;;  %v565_v56 = vmax.f32 %v439_v52, 0.0 }
  0xde   :  { %v1596_v59 = vpop.f32.mrf.mxu0  ;;  %1693 = vmatmul.mubr.f32.gmra.mxu1 %v546_v54  ;;  %v468_v22 = vpop.f32.mrf.mxu1  ;;  %v434_v54 = vadd.f32 %v2201_v31, %v2191_v16  ;;  %v454_v31 = vadd.f32 %v2214_v50, %v2191_v16  ;;  %v474_v50 = vadd.f32 %v2230_v14, %v2191_v16  ;;  %v961_v14 = vld [vmem:[%s2581_s5] sm:$0xff] }
  0xdf   :  { %v547_v60 = vmax.f32 %v349_v58, 0.0  ;;  %v364_v62 = vadd.f32 %v1596_v59, %v2191_v16  ;;  %v444_v58 = vadd.f32 %v2207_v39, %v2191_v16  ;;  %v469_v57 = vadd.f32 %v2191_v16, %v468_v22 }
  0xe0   :  { %v358_v63 = vpop.f32.mrf.mxu0  ;;  %v1632_v32 = vpop.f32.mrf.mxu1  ;;  %v564_v23 = vmax.f32 %v434_v54, 0.0  ;;  %v464_v39 = vadd.f32 %v2222_v0, %v2191_v16 }
  0xe1   :  { %v359_v1 = vadd.f32 %v2191_v16, %v358_v63  ;;  %1695 = vmatprep.mubr.f32.mxu1 %v547_v60  ;;  %v550_v4 = vmax.f32 %v364_v62, 0.0  ;;  %v567_v60 = vmax.f32 %v449_v36, 0.0  ;;  %v569_v63 = vmax.f32 %v459_v44, 0.0 }
  0xe2   :  { %v1599_v2 = vpop.f32.mrf.mxu0  ;;  %1696 = vmatmul.mubr.f32.gmra.mxu1 %v548_v61  ;;  %v478_v42 = vpop.f32.mrf.mxu1  ;;  %v566_v61 = vmax.f32 %v444_v58, 0.0 }
  0xe3   :  { %v549_v3 = vmax.f32 %v359_v1, 0.0  ;;  %v374_v5 = vadd.f32 %v1599_v2, %v2191_v16  ;;  %v568_v1 = vmax.f32 %v454_v31, 0.0 }
  0xe4   :  { %v368_v6 = vpop.f32.mrf.mxu0  ;;  %v1635_v51 = vpop.f32.mrf.mxu1 }
  0xe5   :  { %v369_v8 = vadd.f32 %v2191_v16, %v368_v6  ;;  %1698 = vmatprep.mubr.f32.mxu1 %v549_v3  ;;  %v552_v11 = vmax.f32 %v374_v5, 0.0  ;;  %v571_v3 = vmax.f32 %v469_v57, 0.0  ;;  %v570_v5 = vmax.f32 %v464_v39, 0.0 }
  0xe6   :  { %v1602_v9 = vpop.f32.mrf.mxu0  ;;  %1699 = vmatmul.mubr.f32.gmra.mxu1 %v550_v4  ;;  %v488_v55 = vpop.f32.mrf.mxu1  ;;  %v479_v4 = vadd.f32 %v2191_v16, %v478_v42  ;;  %v2283_v42 = vld [vmem:[%s2583_s4] ss:$0 sm:$0xff] }
  0xe7   :  { %v551_v10 = vmax.f32 %v369_v8, 0.0  ;;  %v384_v12 = vadd.f32 %v1602_v9, %v2191_v16  ;;  %v489_v8 = vadd.f32 %v2191_v16, %v488_v55  ;;  %v572_v9 = vmax.f32 %v474_v50, 0.0 }
  0xe8   :  { %v378_v13 = vpop.f32.mrf.mxu0  ;;  %v1638_v59 = vpop.f32.mrf.mxu1  ;;  %v573_v7 = vmax.f32 %v479_v4, 0.0 }
  0xe9   :  { %v379_v15 = vadd.f32 %v2191_v16, %v378_v13  ;;  %1701 = vmatprep.mubr.f32.mxu1 %v551_v10  ;;  %v554_v19 = vmax.f32 %v384_v12, 0.0  ;;  %v484_v10 = vadd.f32 %v1632_v32, %v2191_v16  ;;  %v575_v12 = vmax.f32 %v489_v8, 0.0 }
  0xea   :  { %v1605_v17 = vpop.f32.mrf.mxu0  ;;  %1702 = vmatmul.mubr.f32.gmra.mxu1 %v552_v11  ;;  %v498_v62 = vpop.f32.mrf.mxu1  ;;  %v962_v11 = vld [vmem:[%s2581_s5 + $0x8] sm:$0xff]  ;;  %v504_v22 = vadd.f32 %v1638_v59, %v2191_v16 }
  0xeb   :  { %v553_v18 = vmax.f32 %v379_v15, 0.0  ;;  %v394_v20 = vadd.f32 %v1605_v17, %v2191_v16  ;;  %1780 = vmatprep.subr.mxu0 %v962_v11  ;;  %v499_v13 = vadd.f32 %v2191_v16, %v498_v62  ;;  %v574_v15 = vmax.f32 %v484_v10, 0.0 }
  0xec   :  { %v388_v21 = vpop.f32.mrf.mxu0  ;;  %v1641_v2 = vpop.f32.mrf.mxu1  ;;  %1781 = vmatpush3.msra.mxu0 %v962_v11  ;;  %v494_v17 = vadd.f32 %v1635_v51, %v2191_v16 }
  0xed   :  { %v389_v24 = vadd.f32 %v2191_v16, %v388_v21  ;;  %1704 = vmatprep.mubr.f32.mxu1 %v553_v18  ;;  %v556_v27 = vmax.f32 %v394_v20, 0.0  ;;  %1782 = vmatprep.subr.mxu0 %v961_v14 }
  0xee   :  { %v1608_v25 = vpop.f32.mrf.mxu0  ;;  %1705 = vmatmul.mubr.f32.gmra.mxu1 %v554_v19  ;;  %v508_v6 = vpop.f32.mrf.mxu1  ;;  %1783 = vmatpush3.msra.mxu0 %v961_v14  ;;  %v577_v19 = vmax.f32 %v499_v13, 0.0  ;;  %v576_v21 = vmax.f32 %v494_v17, 0.0 }
  0xef   :  { %v555_v26 = vmax.f32 %v389_v24, 0.0  ;;  %v404_v29 = vadd.f32 %v1608_v25, %v2191_v16  ;;  %v509_v20 = vadd.f32 %v2191_v16, %v508_v6 }
  0xf0   :  { %v398_v30 = vpop.f32.mrf.mxu0  ;;  %v1644_v0 = vpop.f32.mrf.mxu1 }
  0xf1   :  { %v399_v33 = vadd.f32 %v2191_v16, %v398_v30  ;;  %1707 = vmatprep.mubr.f32.mxu1 %v555_v26  ;;  %v558_v38 = vmax.f32 %v404_v29, 0.0  ;;  %v579_v25 = vmax.f32 %v509_v20, 0.0  ;;  %v514_v29 = vadd.f32 %v1641_v2, %v2191_v16 }
  0xf2   :  { %v1611_v34 = vpop.f32.mrf.mxu0  ;;  %1708 = vmatmul.mubr.f32.gmra.mxu1 %v556_v27  ;;  %v518_v18 = vpop.f32.mrf.mxu1  ;;  %v578_v27 = vmax.f32 %v504_v22, 0.0 }
  0xf3   :  { %v557_v35 = vmax.f32 %v399_v33, 0.0  ;;  %v414_v40 = vadd.f32 %v1611_v34, %v2191_v16  ;;  %v519_v26 = vadd.f32 %v2191_v16, %v518_v18  ;;  %v580_v34 = vmax.f32 %v514_v29, 0.0 }
  0xf4   :  { %v408_v41 = vpop.f32.mrf.mxu0  ;;  %v1647_v24 = vpop.f32.mrf.mxu1 }
  0xf5   :  { %v409_v43 = vadd.f32 %v2191_v16, %v408_v41  ;;  %1710 = vmatprep.mubr.f32.mxu1 %v557_v35  ;;  %v560_v48 = vmax.f32 %v414_v40, 0.0  ;;  %v581_v32 = vmax.f32 %v519_v26, 0.0  ;;  %v524_v35 = vadd.f32 %v1644_v0, %v2191_v16 }
  0xf6   :  { %1711 = vmatmul.mubr.f32.gmra.mxu1 %v558_v38  ;;  %v528_v30 = vpop.f32.mrf.mxu1  ;;  %v534_v40 = vadd.f32 %v1647_v24, %v2191_v16 }
  0xf7   :  { %v559_v45 = vmax.f32 %v409_v43, 0.0  ;;  %v529_v33 = vadd.f32 %v2191_v16, %v528_v30  ;;  %v582_v38 = vmax.f32 %v524_v35, 0.0 }
  0xf8   :  { %v584_v41 = vmax.f32 %v534_v40, 0.0 }
  0xf9   :  { %1713 = vmatprep.mubr.f32.mxu1 %v559_v45  ;;  %v583_v37 = vmax.f32 %v529_v33, 0.0 }
  0xfa   :  { %1714 = vmatmul.mubr.f32.gmra.mxu1 %v560_v48 }
  0xfb   :  { %1716 = vmatprep.mubr.f32.mxu1 %v561_v46 }
  0xfe   :  { %1717 = vmatmul.mubr.f32.gmra.mxu1 %v562_v53 }
  0xff   :  { %1719 = vmatprep.mubr.f32.mxu1 %v563_v28 }
 0x102   :  { %1720 = vmatmul.mubr.f32.gmra.mxu1 %v564_v23 }
 0x103   :  { %1722 = vmatprep.mubr.f32.mxu1 %v565_v56 }
 0x106   :  { %1723 = vmatmul.mubr.f32.gmra.mxu1 %v566_v61 }
 0x107   :  { %1725 = vmatprep.mubr.f32.mxu1 %v567_v60 }
 0x10a   :  { %1726 = vmatmul.mubr.f32.gmra.mxu1 %v568_v1 }
 0x10b   :  { %1728 = vmatprep.mubr.f32.mxu1 %v569_v63 }
 0x10e   :  { %1729 = vmatmul.mubr.f32.gmra.mxu1 %v570_v5 }
 0x10f   :  { %1731 = vmatprep.mubr.f32.mxu1 %v571_v3 }
 0x112   :  { %1732 = vmatmul.mubr.f32.gmra.mxu1 %v572_v9 }
 0x113   :  { %1734 = vmatprep.mubr.f32.mxu1 %v573_v7 }
 0x116   :  { %1735 = vmatmul.mubr.f32.gmra.mxu1 %v574_v15 }
 0x117   :  { %1737 = vmatprep.mubr.f32.mxu1 %v575_v12 }
 0x11a   :  { %1738 = vmatmul.mubr.f32.gmra.mxu1 %v576_v21 }
 0x11b   :  { %1740 = vmatprep.mubr.f32.mxu1 %v577_v19 }
 0x11e   :  { %1741 = vmatmul.mubr.f32.gmra.mxu1 %v578_v27 }
 0x11f   :  { %1743 = vmatprep.mubr.f32.mxu1 %v579_v25 }
 0x122   :  { %1744 = vmatmul.mubr.f32.gmra.mxu1 %v580_v34 }
 0x123   :  { %1746 = vmatprep.mubr.f32.mxu1 %v581_v32 }
 0x126   :  { %1747 = vmatmul.mubr.f32.gmra.mxu1 %v582_v38 }
 0x127   :  { %1749 = vmatprep.mubr.f32.mxu1 %v583_v37 }
 0x12a   :  { %1750 = vmatmul.mubr.f32.gmra.mxu1 %v584_v41 }
 0x18e   :  { %v1682_v43 = vpop.f32.mrf.mxu1 }
 0x18f   :  { %v680_v45 = vadd.f32 %v1682_v43, %v2283_v42 }
 0x190   :  { %v674_v46 = vpop.f32.mrf.mxu1 }
 0x191   :  { %v675_v47 = vadd.f32 %v2283_v42, %v674_v46  ;;  %v914_v51 = vmax.f32 %v680_v45, 0.0 }
 0x192   :  { %v1685_v48 = vpop.f32.mrf.mxu1 }
 0x193   :  { %v913_v49 = vmax.f32 %v675_v47, 0.0  ;;  %v690_v16 = vadd.f32 %v1685_v48, %v2283_v42 }
 0x194   :  { %v684_v28 = vpop.f32.mrf.mxu1 }
 0x195   :  { %v685_v52 = vadd.f32 %v2283_v42, %v684_v28  ;;  %1784 = vmatprep.mubr.f32.mxu0 %v913_v49  ;;  %v916_v55 = vmax.f32 %v690_v16, 0.0 }
 0x196   :  { %v1688_v53 = vpop.f32.mrf.mxu1  ;;  %1785 = vmatmul.mubr.f32.vlgmr.msra.gmra.mxu0 %v914_v51 }
 0x197   :  { %v915_v54 = vmax.f32 %v685_v52, 0.0  ;;  %v700_v56 = vadd.f32 %v1688_v53, %v2283_v42 }
 0x198   :  { %v694_v36 = vpop.f32.mrf.mxu1 }
 0x199   :  { %v695_v23 = vadd.f32 %v2283_v42, %v694_v36  ;;  %1787 = vmatprep.mubr.f32.mxu0 %v915_v54  ;;  %v918_v60 = vmax.f32 %v700_v56, 0.0 }
 0x19a   :  { %v1691_v58 = vpop.f32.mrf.mxu1  ;;  %1788 = vmatmul.mubr.f32.gmra.mxu0 %v916_v55 }
 0x19b   :  { %v917_v59 = vmax.f32 %v695_v23, 0.0  ;;  %v710_v44 = vadd.f32 %v1691_v58, %v2283_v42 }
 0x19c   :  { %v704_v61 = vpop.f32.mrf.mxu1 }
 0x19d   :  { %v705_v31 = vadd.f32 %v2283_v42, %v704_v61  ;;  %1790 = vmatprep.mubr.f32.mxu0 %v917_v59  ;;  %v920_v57 = vmax.f32 %v710_v44, 0.0 }
 0x19e   :  { %v1694_v62 = vpop.f32.mrf.mxu1  ;;  %1791 = vmatmul.mubr.f32.gmra.mxu0 %v918_v60 }
 0x19f   :  { %v919_v63 = vmax.f32 %v705_v31, 0.0  ;;  %v720_v1 = vadd.f32 %v1694_v62, %v2283_v42 }
 0x1a0   :  { %v714_v39 = vpop.f32.mrf.mxu1 }
 0x1a1   :  { %v715_v2 = vadd.f32 %v2283_v42, %v714_v39  ;;  %1793 = vmatprep.mubr.f32.mxu0 %v919_v63  ;;  %v922_v5 = vmax.f32 %v720_v1, 0.0 }
 0x1a2   :  { %v1697_v3 = vpop.f32.mrf.mxu1  ;;  %1794 = vmatmul.mubr.f32.gmra.mxu0 %v920_v57 }
 0x1a3   :  { %v921_v4 = vmax.f32 %v715_v2, 0.0  ;;  %v730_v50 = vadd.f32 %v1697_v3, %v2283_v42 }
 0x1a4   :  { %v724_v6 = vpop.f32.mrf.mxu1 }
 0x1a5   :  { %v725_v7 = vadd.f32 %v2283_v42, %v724_v6  ;;  %1796 = vmatprep.mubr.f32.mxu0 %v921_v4  ;;  %v924_v10 = vmax.f32 %v730_v50, 0.0 }
 0x1a6   :  { %v1700_v8 = vpop.f32.mrf.mxu1  ;;  %1797 = vmatmul.mubr.f32.gmra.mxu0 %v922_v5 }
 0x1a7   :  { %v923_v9 = vmax.f32 %v725_v7, 0.0  ;;  %v740_v0 = vadd.f32 %v1700_v8, %v2283_v42 }
 0x1a8   :  { %v734_v11 = vpop.f32.mrf.mxu1 }
 0x1a9   :  { %v735_v12 = vadd.f32 %v2283_v42, %v734_v11  ;;  %1799 = vmatprep.mubr.f32.mxu0 %v923_v9  ;;  %v926_v15 = vmax.f32 %v740_v0, 0.0 }
 0x1aa   :  { %v1703_v13 = vpop.f32.mrf.mxu1  ;;  %1800 = vmatmul.mubr.f32.gmra.mxu0 %v924_v10 }
 0x1ab   :  { %v925_v14 = vmax.f32 %v735_v12, 0.0  ;;  %v750_v17 = vadd.f32 %v1703_v13, %v2283_v42 }
 0x1ac   :  { %v744_v18 = vpop.f32.mrf.mxu1 }
 0x1ad   :  { %v745_v19 = vadd.f32 %v2283_v42, %v744_v18  ;;  %1802 = vmatprep.mubr.f32.mxu0 %v925_v14  ;;  %v928_v22 = vmax.f32 %v750_v17, 0.0 }
 0x1ae   :  { %v1706_v20 = vpop.f32.mrf.mxu1  ;;  %1803 = vmatmul.mubr.f32.gmra.mxu0 %v926_v15 }
 0x1af   :  { %v927_v21 = vmax.f32 %v745_v19, 0.0  ;;  %v760_v24 = vadd.f32 %v1706_v20, %v2283_v42 }
 0x1b0   :  { %v754_v25 = vpop.f32.mrf.mxu1 }
 0x1b1   :  { %v755_v26 = vadd.f32 %v2283_v42, %v754_v25  ;;  %1805 = vmatprep.mubr.f32.mxu0 %v927_v21  ;;  %v930_v30 = vmax.f32 %v760_v24, 0.0 }
 0x1b2   :  { %v1709_v27 = vpop.f32.mrf.mxu1  ;;  %1806 = vmatmul.mubr.f32.gmra.mxu0 %v928_v22 }
 0x1b3   :  { %v929_v29 = vmax.f32 %v755_v26, 0.0  ;;  %v770_v32 = vadd.f32 %v1709_v27, %v2283_v42 }
 0x1b4   :  { %v764_v33 = vpop.f32.mrf.mxu1 }
 0x1b5   :  { %v765_v34 = vadd.f32 %v2283_v42, %v764_v33  ;;  %1808 = vmatprep.mubr.f32.mxu0 %v929_v29  ;;  %v932_v38 = vmax.f32 %v770_v32, 0.0 }
 0x1b6   :  { %v1712_v35 = vpop.f32.mrf.mxu1  ;;  %1809 = vmatmul.mubr.f32.gmra.mxu0 %v930_v30 }
 0x1b7   :  { %v931_v37 = vmax.f32 %v765_v34, 0.0  ;;  %v780_v40 = vadd.f32 %v1712_v35, %v2283_v42 }
 0x1b8   :  { %v774_v41 = vpop.f32.mrf.mxu1 }
 0x1b9   :  { %v775_v43 = vadd.f32 %v2283_v42, %v774_v41  ;;  %1811 = vmatprep.mubr.f32.mxu0 %v931_v37  ;;  %v934_v47 = vmax.f32 %v780_v40, 0.0 }
 0x1ba   :  { %v1715_v45 = vpop.f32.mrf.mxu1  ;;  %1812 = vmatmul.mubr.f32.gmra.mxu0 %v932_v38 }
 0x1bb   :  { %v933_v46 = vmax.f32 %v775_v43, 0.0  ;;  %v790_v48 = vadd.f32 %v1715_v45, %v2283_v42 }
 0x1bc   :  { %v784_v49 = vpop.f32.mrf.mxu1 }
 0x1bd   :  { %v785_v51 = vadd.f32 %v2283_v42, %v784_v49  ;;  %1814 = vmatprep.mubr.f32.mxu0 %v933_v46  ;;  %v936_v52 = vmax.f32 %v790_v48, 0.0 }
 0x1be   :  { %v1718_v16 = vpop.f32.mrf.mxu1  ;;  %1815 = vmatmul.mubr.f32.gmra.mxu0 %v934_v47 }
 0x1bf   :  { %v935_v28 = vmax.f32 %v785_v51, 0.0  ;;  %v800_v53 = vadd.f32 %v1718_v16, %v2283_v42 }
 0x1c0   :  { %v794_v54 = vpop.f32.mrf.mxu1 }
 0x1c1   :  { %v795_v55 = vadd.f32 %v2283_v42, %v794_v54  ;;  %1817 = vmatprep.mubr.f32.mxu0 %v935_v28  ;;  %v938_v23 = vmax.f32 %v800_v53, 0.0 }
 0x1c2   :  { %v1721_v56 = vpop.f32.mrf.mxu1  ;;  %1818 = vmatmul.mubr.f32.gmra.mxu0 %v936_v52 }
 0x1c3   :  { %v937_v36 = vmax.f32 %v795_v55, 0.0  ;;  %v810_v58 = vadd.f32 %v1721_v56, %v2283_v42 }
 0x1c4   :  { %v804_v59 = vpop.f32.mrf.mxu1 }
 0x1c5   :  { %v805_v60 = vadd.f32 %v2283_v42, %v804_v59  ;;  %1820 = vmatprep.mubr.f32.mxu0 %v937_v36  ;;  %v940_v31 = vmax.f32 %v810_v58, 0.0 }
 0x1c6   :  { %v1724_v44 = vpop.f32.mrf.mxu1  ;;  %1821 = vmatmul.mubr.f32.gmra.mxu0 %v938_v23 }
 0x1c7   :  { %v939_v61 = vmax.f32 %v805_v60, 0.0  ;;  %v820_v62 = vadd.f32 %v1724_v44, %v2283_v42  ;;  %v2336_v60 = vld [vmem:[%s2584_s6] ss:$0 sm:$0xff] }
 0x1c8   :  { %v814_v63 = vpop.f32.mrf.mxu1 }
 0x1c9   :  { %v815_v57 = vadd.f32 %v2283_v42, %v814_v63  ;;  %1823 = vmatprep.mubr.f32.mxu0 %v939_v61  ;;  %v942_v2 = vmax.f32 %v820_v62, 0.0 }
 0x1ca   :  { %v1727_v1 = vpop.f32.mrf.mxu1  ;;  %1824 = vmatmul.mubr.f32.gmra.mxu0 %v940_v31 }
 0x1cb   :  { %v941_v39 = vmax.f32 %v815_v57, 0.0  ;;  %v830_v3 = vadd.f32 %v1727_v1, %v2283_v42 }
 0x1cc   :  { %v824_v4 = vpop.f32.mrf.mxu1 }
 0x1cd   :  { %v825_v5 = vadd.f32 %v2283_v42, %v824_v4  ;;  %1826 = vmatprep.mubr.f32.mxu0 %v941_v39  ;;  %v944_v7 = vmax.f32 %v830_v3, 0.0 }
 0x1ce   :  { %v1730_v50 = vpop.f32.mrf.mxu1  ;;  %1827 = vmatmul.mubr.f32.gmra.mxu0 %v942_v2 }
 0x1cf   :  { %v943_v6 = vmax.f32 %v825_v5, 0.0  ;;  %v840_v8 = vadd.f32 %v1730_v50, %v2283_v42 }
 0x1d0   :  { %v834_v9 = vpop.f32.mrf.mxu1 }
 0x1d1   :  { %v835_v10 = vadd.f32 %v2283_v42, %v834_v9  ;;  %1829 = vmatprep.mubr.f32.mxu0 %v943_v6  ;;  %v946_v12 = vmax.f32 %v840_v8, 0.0 }
 0x1d2   :  { %v1733_v0 = vpop.f32.mrf.mxu1  ;;  %1830 = vmatmul.mubr.f32.gmra.mxu0 %v944_v7 }
 0x1d3   :  { %v945_v11 = vmax.f32 %v835_v10, 0.0  ;;  %v850_v13 = vadd.f32 %v1733_v0, %v2283_v42 }
 0x1d4   :  { %v844_v14 = vpop.f32.mrf.mxu1 }
 0x1d5   :  { %v845_v15 = vadd.f32 %v2283_v42, %v844_v14  ;;  %1832 = vmatprep.mubr.f32.mxu0 %v945_v11  ;;  %v948_v19 = vmax.f32 %v850_v13, 0.0 }
 0x1d6   :  { %v1736_v17 = vpop.f32.mrf.mxu1  ;;  %1833 = vmatmul.mubr.f32.gmra.mxu0 %v946_v12 }
 0x1d7   :  { %v947_v18 = vmax.f32 %v845_v15, 0.0  ;;  %v860_v20 = vadd.f32 %v1736_v17, %v2283_v42 }
 0x1d8   :  { %v854_v21 = vpop.f32.mrf.mxu1 }
 0x1d9   :  { %v855_v22 = vadd.f32 %v2283_v42, %v854_v21  ;;  %1835 = vmatprep.mubr.f32.mxu0 %v947_v18  ;;  %v950_v26 = vmax.f32 %v860_v20, 0.0 }
 0x1da   :  { %v1739_v24 = vpop.f32.mrf.mxu1  ;;  %1836 = vmatmul.mubr.f32.gmra.mxu0 %v948_v19 }
 0x1db   :  { %v949_v25 = vmax.f32 %v855_v22, 0.0  ;;  %v870_v27 = vadd.f32 %v1739_v24, %v2283_v42 }
 0x1dc   :  { %v864_v29 = vpop.f32.mrf.mxu1 }
 0x1dd   :  { %v865_v30 = vadd.f32 %v2283_v42, %v864_v29  ;;  %1838 = vmatprep.mubr.f32.mxu0 %v949_v25  ;;  %v952_v34 = vmax.f32 %v870_v27, 0.0 }
 0x1de   :  { %v1742_v32 = vpop.f32.mrf.mxu1  ;;  %1839 = vmatmul.mubr.f32.gmra.mxu0 %v950_v26 }
 0x1df   :  { %v951_v33 = vmax.f32 %v865_v30, 0.0  ;;  %v880_v35 = vadd.f32 %v1742_v32, %v2283_v42 }
 0x1e0   :  { %v874_v37 = vpop.f32.mrf.mxu1 }
 0x1e1   :  { %v875_v38 = vadd.f32 %v2283_v42, %v874_v37  ;;  %1841 = vmatprep.mubr.f32.mxu0 %v951_v33  ;;  %v954_v43 = vmax.f32 %v880_v35, 0.0 }
 0x1e2   :  { %v1745_v40 = vpop.f32.mrf.mxu1  ;;  %1842 = vmatmul.mubr.f32.gmra.mxu0 %v952_v34 }
 0x1e3   :  { %v953_v41 = vmax.f32 %v875_v38, 0.0  ;;  %v890_v45 = vadd.f32 %v1745_v40, %v2283_v42 }
 0x1e4   :  { %v884_v46 = vpop.f32.mrf.mxu1 }
 0x1e5   :  { %v885_v47 = vadd.f32 %v2283_v42, %v884_v46  ;;  %1844 = vmatprep.mubr.f32.mxu0 %v953_v41  ;;  %v956_v51 = vmax.f32 %v890_v45, 0.0 }
 0x1e6   :  { %v1748_v48 = vpop.f32.mrf.mxu1  ;;  %1845 = vmatmul.mubr.f32.gmra.mxu0 %v954_v43 }
 0x1e7   :  { %v955_v49 = vmax.f32 %v885_v47, 0.0  ;;  %v900_v16 = vadd.f32 %v1748_v48, %v2283_v42 }
 0x1e8   :  { %v894_v28 = vpop.f32.mrf.mxu1 }
 0x1e9   :  { %v895_v52 = vadd.f32 %v2283_v42, %v894_v28  ;;  %1847 = vmatprep.mubr.f32.mxu0 %v955_v49  ;;  %v958_v55 = vmax.f32 %v900_v16, 0.0 }
 0x1ea   :  { %v1751_v53 = vpop.f32.mrf.mxu1  ;;  %1848 = vmatmul.mubr.f32.gmra.mxu0 %v956_v51 }
 0x1eb   :  { %v957_v54 = vmax.f32 %v895_v52, 0.0  ;;  %v910_v56 = vadd.f32 %v1751_v53, %v2283_v42 }
 0x1ec   :  { %v904_v36 = vpop.f32.mrf.mxu1 }
 0x1ed   :  { %v905_v23 = vadd.f32 %v2283_v42, %v904_v36  ;;  %1850 = vmatprep.mubr.f32.mxu0 %v957_v54  ;;  %v960_v59 = vmax.f32 %v910_v56, 0.0 }
 0x1ee   :  { %1851 = vmatmul.mubr.f32.gmra.mxu0 %v958_v55 }
 0x1ef   :  { %v959_v58 = vmax.f32 %v905_v23, 0.0 }
 0x1f1   :  { %1853 = vmatprep.mubr.f32.mxu0 %v959_v58 }
 0x1f2   :  { %1854 = vmatmul.mubr.f32.gmra.mxu0 %v960_v59 }
 0x256   :  { %v1786_v44 = vpop.f32.mrf.mxu0 }
 0x257   :  { %v1056_v61 = vadd.f32 %v1786_v44, %v2336_v60 }
 0x258   :  { %v1050_v31 = vpop.f32.mrf.mxu0 }
 0x259   :  { %1291 = vst.msk [vmem:[%s2585_s7 + $0x8] sm:$0xff] %vm1289_vm2, %v1056_v61  ;;  %v1051_v42 = vadd.f32 %v2336_v60, %v1050_v31 }
 0x25a   :  { %v1789_v62 = vpop.f32.mrf.mxu0 }
 0x25b   :  { %1290 = vst.msk [vmem:[%s2585_s7] sm:$0xff] %vm1289_vm2, %v1051_v42  ;;  %v1066_v63 = vadd.f32 %v1789_v62, %v2336_v60 }
 0x25c   :  { %v1060_v57 = vpop.f32.mrf.mxu0 }
 0x25d   :  { %1293 = vst.msk [vmem:[%s2585_s7 + $0x18] sm:$0xff] %vm1289_vm2, %v1066_v63  ;;  %v1061_v1 = vadd.f32 %v2336_v60, %v1060_v57 }
 0x25e   :  { %v1792_v39 = vpop.f32.mrf.mxu0 }
 0x25f   :  { %1292 = vst.msk [vmem:[%s2585_s7 + $0x10] sm:$0xff] %vm1289_vm2, %v1061_v1  ;;  %v1076_v2 = vadd.f32 %v1792_v39, %v2336_v60 }
 0x260   :  { %v1070_v3 = vpop.f32.mrf.mxu0 }
 0x261   :  { %1295 = vst.msk [vmem:[%s2585_s7 + $0x28] sm:$0xff] %vm1289_vm2, %v1076_v2  ;;  %v1071_v4 = vadd.f32 %v2336_v60, %v1070_v3 }
 0x262   :  { %v1795_v5 = vpop.f32.mrf.mxu0 }
 0x263   :  { %1294 = vst.msk [vmem:[%s2585_s7 + $0x20] sm:$0xff] %vm1289_vm2, %v1071_v4  ;;  %v1086_v50 = vadd.f32 %v1795_v5, %v2336_v60 }
 0x264   :  { %v1080_v6 = vpop.f32.mrf.mxu0 }
 0x265   :  { %1297 = vst.msk [vmem:[%s2585_s7 + $0x38] sm:$0xff] %vm1289_vm2, %v1086_v50  ;;  %v1081_v7 = vadd.f32 %v2336_v60, %v1080_v6 }
 0x266   :  { %v1798_v8 = vpop.f32.mrf.mxu0 }
 0x267   :  { %1296 = vst.msk [vmem:[%s2585_s7 + $0x30] sm:$0xff] %vm1289_vm2, %v1081_v7  ;;  %v1096_v9 = vadd.f32 %v1798_v8, %v2336_v60 }
 0x268   :  { %v1090_v10 = vpop.f32.mrf.mxu0 }
 0x269   :  { %1299 = vst.msk [vmem:[%s2585_s7 + $0x48] sm:$0xff] %vm1289_vm2, %v1096_v9  ;;  %v1091_v0 = vadd.f32 %v2336_v60, %v1090_v10 }
 0x26a   :  { %v1801_v11 = vpop.f32.mrf.mxu0 }
 0x26b   :  { %1298 = vst.msk [vmem:[%s2585_s7 + $0x40] sm:$0xff] %vm1289_vm2, %v1091_v0  ;;  %v1106_v12 = vadd.f32 %v1801_v11, %v2336_v60 }
 0x26c   :  { %v1100_v13 = vpop.f32.mrf.mxu0 }
 0x26d   :  { %1301 = vst.msk [vmem:[%s2585_s7 + $0x58] sm:$0xff] %vm1289_vm2, %v1106_v12  ;;  %v1101_v14 = vadd.f32 %v2336_v60, %v1100_v13 }
 0x26e   :  { %v1804_v15 = vpop.f32.mrf.mxu0 }
 0x26f   :  { %1300 = vst.msk [vmem:[%s2585_s7 + $0x50] sm:$0xff] %vm1289_vm2, %v1101_v14  ;;  %v1116_v17 = vadd.f32 %v1804_v15, %v2336_v60 }
 0x270   :  { %v1110_v18 = vpop.f32.mrf.mxu0 }
 0x271   :  { %1303 = vst.msk [vmem:[%s2585_s7 + $0x68] sm:$0xff] %vm1289_vm2, %v1116_v17  ;;  %v1111_v19 = vadd.f32 %v2336_v60, %v1110_v18 }
 0x272   :  { %v1807_v20 = vpop.f32.mrf.mxu0 }
 0x273   :  { %1302 = vst.msk [vmem:[%s2585_s7 + $0x60] sm:$0xff] %vm1289_vm2, %v1111_v19  ;;  %v1126_v21 = vadd.f32 %v1807_v20, %v2336_v60 }
 0x274   :  { %v1120_v22 = vpop.f32.mrf.mxu0 }
 0x275   :  { %1305 = vst.msk [vmem:[%s2585_s7 + $0x78] sm:$0xff] %vm1289_vm2, %v1126_v21  ;;  %v1121_v24 = vadd.f32 %v2336_v60, %v1120_v22 }
 0x276   :  { %v1810_v25 = vpop.f32.mrf.mxu0 }
 0x277   :  { %1304 = vst.msk [vmem:[%s2585_s7 + $0x70] sm:$0xff] %vm1289_vm2, %v1121_v24  ;;  %v1136_v26 = vadd.f32 %v1810_v25, %v2336_v60 }
 0x278   :  { %v1130_v27 = vpop.f32.mrf.mxu0 }
 0x279   :  { %1307 = vst.msk [vmem:[%s2585_s7 + $0x88] sm:$0xff] %vm1289_vm2, %v1136_v26  ;;  %v1131_v29 = vadd.f32 %v2336_v60, %v1130_v27 }
 0x27a   :  { %v1813_v30 = vpop.f32.mrf.mxu0 }
 0x27b   :  { %1306 = vst.msk [vmem:[%s2585_s7 + $0x80] sm:$0xff] %vm1289_vm2, %v1131_v29  ;;  %v1146_v32 = vadd.f32 %v1813_v30, %v2336_v60 }
 0x27c   :  { %v1140_v33 = vpop.f32.mrf.mxu0 }
 0x27d   :  { %1309 = vst.msk [vmem:[%s2585_s7 + $0x98] sm:$0xff] %vm1289_vm2, %v1146_v32  ;;  %v1141_v34 = vadd.f32 %v2336_v60, %v1140_v33 }
 0x27e   :  { %v1816_v35 = vpop.f32.mrf.mxu0 }
 0x27f   :  { %1308 = vst.msk [vmem:[%s2585_s7 + $0x90] sm:$0xff] %vm1289_vm2, %v1141_v34  ;;  %v1156_v37 = vadd.f32 %v1816_v35, %v2336_v60 }
 0x280   :  { %v1150_v38 = vpop.f32.mrf.mxu0 }
 0x281   :  { %1311 = vst.msk [vmem:[%s2585_s7 + $0xa8] sm:$0xff] %vm1289_vm2, %v1156_v37  ;;  %v1151_v40 = vadd.f32 %v2336_v60, %v1150_v38 }
 0x282   :  { %v1819_v41 = vpop.f32.mrf.mxu0 }
 0x283   :  { %1310 = vst.msk [vmem:[%s2585_s7 + $0xa0] sm:$0xff] %vm1289_vm2, %v1151_v40  ;;  %v1166_v43 = vadd.f32 %v1819_v41, %v2336_v60 }
 0x284   :  { %v1160_v45 = vpop.f32.mrf.mxu0 }
 0x285   :  { %1313 = vst.msk [vmem:[%s2585_s7 + $0xb8] sm:$0xff] %vm1289_vm2, %v1166_v43  ;;  %v1161_v46 = vadd.f32 %v2336_v60, %v1160_v45 }
 0x286   :  { %v1822_v47 = vpop.f32.mrf.mxu0 }
 0x287   :  { %1312 = vst.msk [vmem:[%s2585_s7 + $0xb0] sm:$0xff] %vm1289_vm2, %v1161_v46  ;;  %v1176_v48 = vadd.f32 %v1822_v47, %v2336_v60 }
 0x288   :  { %v1170_v49 = vpop.f32.mrf.mxu0 }
 0x289   :  { %1315 = vst.msk [vmem:[%s2585_s7 + $0xc8] sm:$0xff] %vm1289_vm2, %v1176_v48  ;;  %v1171_v51 = vadd.f32 %v2336_v60, %v1170_v49 }
 0x28a   :  { %v1825_v16 = vpop.f32.mrf.mxu0 }
 0x28b   :  { %1314 = vst.msk [vmem:[%s2585_s7 + $0xc0] sm:$0xff] %vm1289_vm2, %v1171_v51  ;;  %v1186_v28 = vadd.f32 %v1825_v16, %v2336_v60 }
 0x28c   :  { %v1180_v52 = vpop.f32.mrf.mxu0 }
 0x28d   :  { %1317 = vst.msk [vmem:[%s2585_s7 + $0xd8] sm:$0xff] %vm1289_vm2, %v1186_v28  ;;  %v1181_v53 = vadd.f32 %v2336_v60, %v1180_v52 }
 0x28e   :  { %v1828_v54 = vpop.f32.mrf.mxu0 }
 0x28f   :  { %1316 = vst.msk [vmem:[%s2585_s7 + $0xd0] sm:$0xff] %vm1289_vm2, %v1181_v53  ;;  %v1196_v55 = vadd.f32 %v1828_v54, %v2336_v60 }
 0x290   :  { %v1190_v56 = vpop.f32.mrf.mxu0 }
 0x291   :  { %1319 = vst.msk [vmem:[%s2585_s7 + $0xe8] sm:$0xff] %vm1289_vm2, %v1196_v55  ;;  %v1191_v36 = vadd.f32 %v2336_v60, %v1190_v56 }
 0x292   :  { %v1831_v23 = vpop.f32.mrf.mxu0 }
 0x293   :  { %1318 = vst.msk [vmem:[%s2585_s7 + $0xe0] sm:$0xff] %vm1289_vm2, %v1191_v36  ;;  %v1206_v58 = vadd.f32 %v1831_v23, %v2336_v60 }
 0x294   :  { %v1200_v59 = vpop.f32.mrf.mxu0 }
 0x295   :  { %1321 = vst.msk [vmem:[%s2585_s7 + $0xf8] sm:$0xff] %vm1289_vm2, %v1206_v58  ;;  %v1201_v44 = vadd.f32 %v2336_v60, %v1200_v59 }
 0x296   :  { %v1834_v61 = vpop.f32.mrf.mxu0 }
 0x297   :  { %1320 = vst.msk [vmem:[%s2585_s7 + $0xf0] sm:$0xff] %vm1289_vm2, %v1201_v44  ;;  %v1216_v31 = vadd.f32 %v1834_v61, %v2336_v60 }
 0x298   :  { %v1210_v42 = vpop.f32.mrf.mxu0 }
 0x299   :  { %1323 = vst.msk [vmem:[%s2585_s7 + $0x108] sm:$0xff] %vm1289_vm2, %v1216_v31  ;;  %v1211_v62 = vadd.f32 %v2336_v60, %v1210_v42 }
 0x29a   :  { %v1837_v63 = vpop.f32.mrf.mxu0 }
 0x29b   :  { %1322 = vst.msk [vmem:[%s2585_s7 + $0x100] sm:$0xff] %vm1289_vm2, %v1211_v62  ;;  %v1226_v57 = vadd.f32 %v1837_v63, %v2336_v60 }
 0x29c   :  { %v1220_v1 = vpop.f32.mrf.mxu0 }
 0x29d   :  { %1325 = vst.msk [vmem:[%s2585_s7 + $0x118] sm:$0xff] %vm1289_vm2, %v1226_v57  ;;  %v1221_v39 = vadd.f32 %v2336_v60, %v1220_v1 }
 0x29e   :  { %v1840_v2 = vpop.f32.mrf.mxu0 }
 0x29f   :  { %1324 = vst.msk [vmem:[%s2585_s7 + $0x110] sm:$0xff] %vm1289_vm2, %v1221_v39  ;;  %v1236_v3 = vadd.f32 %v1840_v2, %v2336_v60 }
 0x2a0   :  { %v1230_v4 = vpop.f32.mrf.mxu0 }
 0x2a1   :  { %1327 = vst.msk [vmem:[%s2585_s7 + $0x128] sm:$0xff] %vm1289_vm2, %v1236_v3  ;;  %v1231_v5 = vadd.f32 %v2336_v60, %v1230_v4 }
 0x2a2   :  { %v1843_v50 = vpop.f32.mrf.mxu0 }
 0x2a3   :  { %1326 = vst.msk [vmem:[%s2585_s7 + $0x120] sm:$0xff] %vm1289_vm2, %v1231_v5  ;;  %v1246_v6 = vadd.f32 %v1843_v50, %v2336_v60 }
 0x2a4   :  { %v1240_v7 = vpop.f32.mrf.mxu0 }
 0x2a5   :  { %1329 = vst.msk [vmem:[%s2585_s7 + $0x138] sm:$0xff] %vm1289_vm2, %v1246_v6  ;;  %v1241_v8 = vadd.f32 %v2336_v60, %v1240_v7 }
 0x2a6   :  { %v1846_v9 = vpop.f32.mrf.mxu0 }
 0x2a7   :  { %1328 = vst.msk [vmem:[%s2585_s7 + $0x130] sm:$0xff] %vm1289_vm2, %v1241_v8  ;;  %v1256_v10 = vadd.f32 %v1846_v9, %v2336_v60 }
 0x2a8   :  { %v1250_v0 = vpop.f32.mrf.mxu0 }
 0x2a9   :  { %1331 = vst.msk [vmem:[%s2585_s7 + $0x148] sm:$0xff] %vm1289_vm2, %v1256_v10  ;;  %v1251_v11 = vadd.f32 %v2336_v60, %v1250_v0 }
 0x2aa   :  { %v1849_v12 = vpop.f32.mrf.mxu0 }
 0x2ab   :  { %1330 = vst.msk [vmem:[%s2585_s7 + $0x140] sm:$0xff] %vm1289_vm2, %v1251_v11  ;;  %v1266_v13 = vadd.f32 %v1849_v12, %v2336_v60 }
 0x2ac   :  { %v1260_v14 = vpop.f32.mrf.mxu0 }
 0x2ad   :  { %1333 = vst.msk [vmem:[%s2585_s7 + $0x158] sm:$0xff] %vm1289_vm2, %v1266_v13  ;;  %v1261_v15 = vadd.f32 %v2336_v60, %v1260_v14 }
 0x2ae   :  { %v1852_v17 = vpop.f32.mrf.mxu0 }
 0x2af   :  { %1332 = vst.msk [vmem:[%s2585_s7 + $0x150] sm:$0xff] %vm1289_vm2, %v1261_v15  ;;  %v1276_v18 = vadd.f32 %v1852_v17, %v2336_v60 }
 0x2b0   :  { %v1270_v19 = vpop.f32.mrf.mxu0 }
 0x2b1   :  { %1335 = vst.msk [vmem:[%s2585_s7 + $0x168] sm:$0xff] %vm1289_vm2, %v1276_v18  ;;  %v1271_v20 = vadd.f32 %v2336_v60, %v1270_v19 }
 0x2b2   :  { %v1855_v21 = vpop.f32.mrf.mxu0 }
 0x2b3   :  { %1334 = vst.msk [vmem:[%s2585_s7 + $0x160] sm:$0xff] %vm1289_vm2, %v1271_v20  ;;  %v1286_v22 = vadd.f32 %v1855_v21, %v2336_v60 }
 0x2b4   :  { %v1280_v24 = vpop.f32.mrf.mxu0 }
 0x2b5   :  { %1337 = vst.msk [vmem:[%s2585_s7 + $0x178] sm:$0xff] %vm1289_vm2, %v1286_v22  ;;  %v1281_v25 = vadd.f32 %v2336_v60, %v1280_v24 }
 0x2b7   :  { %1336 = vst.msk [vmem:[%s2585_s7 + $0x170] sm:$0xff] %vm1289_vm2, %v1281_v25 }

</bundles_post_ra>
